<compile_context>
chip_gen: v5e
topology: v5e:2x2
jax: 0.10.0
libtpu: 0.0.40
codegen_flags: <defaults>
</compile_context>

<pallas_src>
import functools

import jax
import jax.numpy as jnp
from jax.experimental import pallas as pl
from jax.experimental.pallas import tpu as pltpu


def _layernorm_kernel(x_ref, gamma_ref, beta_ref, o_ref, *, eps):
    # x_ref: (1, C, tile_T) tile in VMEM. Normalize each (b, t) column over the C axis.
    x = x_ref[...].astype(jnp.float32)                    # (1, C, tile_T)
    inv_c = 1.0 / x.shape[-2]
    s = jnp.sum(x, axis=-2, keepdims=True)                # (1, 1, tile_T)
    sq = jnp.sum(x * x, axis=-2, keepdims=True)           # (1, 1, tile_T)
    mean = s * inv_c
    var = jnp.maximum(sq * inv_c - mean * mean, 0.0)      # biased var, like F.layer_norm
    inv = jax.lax.rsqrt(var + eps)
    # gamma/beta are (1, C, 1) f32 — broadcast across the lane (T) axis.
    y = (x - mean) * inv * gamma_ref[...] + beta_ref[...]
    o_ref[...] = y.astype(o_ref.dtype)


def layer_norm_pallas(x, gamma, beta, eps=1e-5, tile_t=512):
    """x: (B, C, T) channels-first. gamma, beta: (C,). Returns (B, C, T)."""
    B, C, T = x.shape

    # VMEM budget: ~2 in bufs + 2 out bufs + f32 working copies per grid step.
    # Keep the per-step footprint well under the scoped limit on every generation
    # (v5e default 16 MiB scoped, v7x 64 MiB physical).
    budget_bytes = 16 * 1024 * 1024
    bytes_per_col = C * 4 * 6  # ~6 f32-sized copies of one (C, 1) column
    cap = max(128, (budget_bytes // bytes_per_col) // 128 * 128)
    tile_t = min(tile_t, cap)

    if T <= tile_t:
        # Full-extent block along T (always a legal block shape, lane-dense if T >= 128).
        tile_t_eff = T
        t_pad = T
    else:
        # tile_t is a multiple of 128 -> lane-dense, layout-friendly blocks.
        tile_t_eff = tile_t
        t_pad = pl.cdiv(T, tile_t_eff) * tile_t_eff

    x_in = x if t_pad == T else jnp.pad(x, ((0, 0), (0, 0), (0, t_pad - T)))

    # Pre-cast params once in the wrapper; kept VMEM-resident via constant index_map.
    gamma3d = gamma.astype(jnp.float32).reshape(1, C, 1)
    beta3d = beta.astype(jnp.float32).reshape(1, C, 1)

    kernel = functools.partial(_layernorm_kernel, eps=eps)
    grid = (B, t_pad // tile_t_eff)

    out = pl.pallas_call(
        kernel,
        out_shape=jax.ShapeDtypeStruct((B, C, t_pad), x.dtype),
        grid_spec=pltpu.PrefetchScalarGridSpec(
            num_scalar_prefetch=0,
            grid=grid,
            in_specs=[
                pl.BlockSpec((1, C, tile_t_eff), lambda b, t: (b, 0, t)),
                pl.BlockSpec((1, C, 1), lambda b, t: (0, 0, 0)),
                pl.BlockSpec((1, C, 1), lambda b, t: (0, 0, 0)),
            ],
            out_specs=pl.BlockSpec((1, C, tile_t_eff), lambda b, t: (b, 0, t)),
        ),
        compiler_params=pltpu.CompilerParams(
            dimension_semantics=("parallel", "parallel"),
            vmem_limit_bytes=32 * 1024 * 1024,
        ),
    )(x_in, gamma3d, beta3d)

    if t_pad != T:
        out = out[:, :, :T]
    return out


def layer_norm_ref(x, gamma, beta, eps=1e-5):
    # Pure-JAX reference mirroring the PyTorch module.
    xt = jnp.transpose(x, (0, 2, 1))  # (B, T, C)
    mean = jnp.mean(xt, axis=-1, keepdims=True)
    var = jnp.mean((xt - mean) ** 2, axis=-1, keepdims=True)
    y = (xt - mean) / jnp.sqrt(var + eps) * gamma + beta
    return jnp.transpose(y, (0, 2, 1))


if __name__ == "__main__":
    key = jax.random.PRNGKey(0)
    B, C, T = 2, 4, 16  # small shapes consistent with the module's (B, C, T) usage
    x = jax.random.normal(key, (B, C, T), dtype=jnp.float32)

    # Deterministic parameter init matching nn.Parameter(torch.ones/zeros(channels)).
    gamma = jnp.ones((C,), dtype=jnp.float32)
    beta = jnp.zeros((C,), dtype=jnp.float32)

    out = layer_norm_pallas(x, gamma, beta, eps=1e-5)
    out = jax.block_until_ready(out)

    ref = layer_norm_ref(x, gamma, beta, eps=1e-5)
    assert out.shape == (B, C, T)
    assert jnp.allclose(out, ref, atol=1e-5, rtol=1e-5)

    print("KERNEL_OK")
</pallas_src>

<mosaic_0001>
module attributes {stable_mosaic.version = 11 : i64} {
  func.func @_layernorm_kernel(%arg0: i32, %arg1: i32, %arg2: memref<1x4x16xf32, #tpu.memory_space<vmem>>, %arg3: memref<1x4x1xf32, #tpu.memory_space<vmem>>, %arg4: memref<1x4x1xf32, #tpu.memory_space<vmem>>, %arg5: memref<1x4x16xf32, #tpu.memory_space<vmem>>) attributes {dimension_semantics = [#tpu.dimension_semantics<parallel>, #tpu.dimension_semantics<parallel>], iteration_bounds = array<i64: 2, 1>, scalar_prefetch = 0 : i64, scratch_operands = 0 : i64, tpu.core_type = #tpu.core_type<tc>, window_params = [{transform_indices = @transform_0, window_bounds = array<i64: 1, 4, 16>}, {pipeline_mode = #tpu.pipeline_mode<synchronous>, transform_indices = @transform_1, window_bounds = array<i64: 1, 4, 1>}, {pipeline_mode = #tpu.pipeline_mode<synchronous>, transform_indices = @transform_2, window_bounds = array<i64: 1, 4, 1>}, {transform_indices = @transform_3, window_bounds = array<i64: 1, 4, 16>}]} {
    %c0 = arith.constant 0 : index
    %c0_0 = arith.constant 0 : index
    %c0_1 = arith.constant 0 : index
    %0 = vector.load %arg2[%c0, %c0_0, %c0_1] : memref<1x4x16xf32, #tpu.memory_space<vmem>>, vector<1x4x16xf32>
    %cst = arith.constant dense<0.000000e+00> : vector<1x16xf32>
    %1 = vector.multi_reduction <add>, %0, %cst [1] : vector<1x4x16xf32> to vector<1x16xf32>
    %2 = vector.shape_cast %1 : vector<1x16xf32> to vector<1x1x16xf32>
    %3 = arith.mulf %0, %0 : vector<1x4x16xf32>
    %cst_2 = arith.constant dense<0.000000e+00> : vector<1x16xf32>
    %4 = vector.multi_reduction <add>, %3, %cst_2 [1] : vector<1x4x16xf32> to vector<1x16xf32>
    %5 = vector.shape_cast %4 : vector<1x16xf32> to vector<1x1x16xf32>
    %cst_3 = arith.constant 2.500000e-01 : f32
    %6 = vector.broadcast %cst_3 : f32 to vector<1x1x16xf32>
    %7 = arith.mulf %2, %6 : vector<1x1x16xf32>
    %cst_4 = arith.constant 2.500000e-01 : f32
    %8 = vector.broadcast %cst_4 : f32 to vector<1x1x16xf32>
    %9 = arith.mulf %5, %8 : vector<1x1x16xf32>
    %10 = arith.mulf %7, %7 : vector<1x1x16xf32>
    %11 = arith.subf %9, %10 : vector<1x1x16xf32>
    %cst_5 = arith.constant 0.000000e+00 : f32
    %12 = vector.broadcast %cst_5 : f32 to vector<1x1x16xf32>
    %13 = arith.maximumf %11, %12 : vector<1x1x16xf32>
    %cst_6 = arith.constant 9.99999974E-6 : f32
    %14 = vector.broadcast %cst_6 : f32 to vector<1x1x16xf32>
    %15 = arith.addf %13, %14 : vector<1x1x16xf32>
    %16 = math.rsqrt %15 : vector<1x1x16xf32>
    %17 = vector.broadcast %7 : vector<1x1x16xf32> to vector<1x4x16xf32>
    %18 = arith.subf %0, %17 : vector<1x4x16xf32>
    %19 = vector.broadcast %16 : vector<1x1x16xf32> to vector<1x4x16xf32>
    %20 = arith.mulf %18, %19 : vector<1x4x16xf32>
    %c0_7 = arith.constant 0 : index
    %c0_8 = arith.constant 0 : index
    %c0_9 = arith.constant 0 : index
    %21 = vector.load %arg3[%c0_7, %c0_8, %c0_9] : memref<1x4x1xf32, #tpu.memory_space<vmem>>, vector<1x4x1xf32>
    %22 = vector.broadcast %21 : vector<1x4x1xf32> to vector<1x4x16xf32>
    %23 = arith.mulf %20, %22 : vector<1x4x16xf32>
    %c0_10 = arith.constant 0 : index
    %c0_11 = arith.constant 0 : index
    %c0_12 = arith.constant 0 : index
    %24 = vector.load %arg4[%c0_10, %c0_11, %c0_12] : memref<1x4x1xf32, #tpu.memory_space<vmem>>, vector<1x4x1xf32>
    %25 = vector.broadcast %24 : vector<1x4x1xf32> to vector<1x4x16xf32>
    %26 = arith.addf %23, %25 : vector<1x4x16xf32>
    %c0_13 = arith.constant 0 : index
    %c0_14 = arith.constant 0 : index
    %c0_15 = arith.constant 0 : index
    %27 = vector.load %arg5[%c0_13, %c0_14, %c0_15] : memref<1x4x16xf32, #tpu.memory_space<vmem>>, vector<1x4x16xf32>
    tpu.vector_store %arg5[%c0_13, %c0_14, %c0_15], %26 {strides = array<i32>} : memref<1x4x16xf32, #tpu.memory_space<vmem>>, vector<1x4x16xf32>,
    return
  }
  func.func @transform_0(%arg0: i32, %arg1: i32) -> (i32, i32, i32) {
    %c0_i32 = arith.constant 0 : i32
    %c0_i32_0 = arith.constant 0 : i32
    return %arg0, %c0_i32, %arg1 : i32, i32, i32
  }
  func.func @transform_1(%arg0: i32, %arg1: i32) -> (i32, i32, i32) {
    %c0_i32 = arith.constant 0 : i32
    %c0_i32_0 = arith.constant 0 : i32
    %c0_i32_1 = arith.constant 0 : i32
    %c0_i32_2 = arith.constant 0 : i32
    return %c0_i32, %c0_i32_0, %c0_i32_1 : i32, i32, i32
  }
  func.func @transform_2(%arg0: i32, %arg1: i32) -> (i32, i32, i32) {
    %c0_i32 = arith.constant 0 : i32
    %c0_i32_0 = arith.constant 0 : i32
    %c0_i32_1 = arith.constant 0 : i32
    %c0_i32_2 = arith.constant 0 : i32
    return %c0_i32, %c0_i32_0, %c0_i32_1 : i32, i32, i32
  }
  func.func @transform_3(%arg0: i32, %arg1: i32) -> (i32, i32, i32) {
    %c0_i32 = arith.constant 0 : i32
    %c0_i32_0 = arith.constant 0 : i32
    return %arg0, %c0_i32, %arg1 : i32, i32, i32
  }
}

</mosaic_0001>

<bundles_post_ra>
// kernel: tpu_custom_call.1
= control target key start
LH: loop header
LB: loop body
LE: loop exit
PB: predicated region body
PF: predicated region fallthrough
CT: control target
= control target key end

     0   :  { %8 = vsyncpa [#allocation3], 0  ;;  %s606_s0 = inlined_call_operand.vmem [shape: f32[2,4,16], index: 0, kind: input, shape index: {}]   ;;  %s607_s1 = inlined_call_operand.vmem [shape: f32[1,4,1], index: 1, kind: input, shape index: {}]   ;;  %s608_s2 = inlined_call_operand.vmem [shape: f32[1,4,1], index: 2, kind: input, shape index: {}]   ;;  %s609_s3 = inlined_call_operand.hbm [shape: f32[2,4,16], index: 3, kind: output, shape index: {}]  }
   0x1   :  { %10 = vsyncpa [#allocation3 + $0x1], 0  ;;  %s500_s12 = smov 0   ;;  %s502_s13 = smov 0  }
   0x2   :  { %s504_s14 = smov 0   ;;  %s506_s15 = smov 0  }
   0x3   :  { %s508_s16 = smov 0   ;;  %s510_s17 = smov 0  }
   0x4 LB: > { %s329_s18 = sadd.s32 4294967295, %s477_s17   ;;  %s330_s19 = sadd.s32 4294967294, %s477_s17   ;;  %s477_s17 = sphi %s510_s17, %s16_s17   ;;  %s473_s16 = sphi %s508_s16, %s616_s16   ;;  %s469_s15 = sphi %s506_s15, %s615_s15   ;;  %s465_s14 = sphi %s504_s14, %s614_s14   ;;  %s461_s13 = sphi %s502_s13, %s613_s13   ;;  %s457_s12 = sphi %s500_s12, %s612_s12  }
   0x5   : > { %s28_s20 = sadd.s32 1, %s473_s16  ;;  %s107_s21 = sadd.s32 1, %s465_s14 }
   0x6   : > { %p30_p0 = scmp.ge.s32.totalorder %s28_s20, 2  ;;  %p117_p1 = scmp.ne.s32.totalorder %s465_s14, %s461_s13 }
   0x7   : > { %p118_p2 = scmp.eq.s32.totalorder %s329_s18, 1  ;;  %p123_p3 = scmp.ne.s32.totalorder %s461_s13, %s457_s12 }
   0x8   : > { %s618_s20 = smov (%p30_p0, %s28_s20), 0  ;;  %p124_p5 = scmp.eq.s32.totalorder %s330_s19, 1 }
   0x9   : > { %p540_p4 = por %p118_p2, %p117_p1  ;;  %s102_s23 = ssub.s32 %s473_s16, %s618_s20 }
   0xa   : > { %p333_p6 = scmp.ge.s32.totalorder %s477_s17, 1  ;;  %p105_p7 = scmp.eq.s32.totalorder %s102_s23, 0 }
   0xb   : > { %p547_p8 = por %p124_p5, %p123_p3  ;;  %p158_p9 = scmp.lt.s32.totalorder %s477_s17, 3 }
   0xc   : > { %s553_s25 = scalar_select %p105_p7, %s465_s14, %s107_s21  }
   0xd   : > { %p159_p10 = pnand %p333_p6, %p158_p9 }
   0xe   : > { %p184_p11 = scmp.lt.s32.totalorder (!%p159_p10), %s469_s15, 1  ;;  %s181_s8 = sand.u32 (!%p159_p10), 1, %s461_s13  }
   0xf   : > { %162 = sbr.rel (%p159_p10) target bundleno = 150 (0x96), region = 32  ;;  %s334_s9 = sshll.u32 (!%p159_p10), %s181_s8, 2 }
  0x10   : > { %s337_s10 = sshll.u32 (!%p159_p10), %s469_s15, 2  ;;  %s183_s21 = scalar_lea.vmem (!%p159_p10), [#allocation2], %s334_s9 }
  0x11   : > { %s253_s19 = scalar_lea.hbm (!%p159_p10), %s609_s3, %s337_s10  ;;  %s255_s23 = sshll.u32 (!%p159_p10), %s183_s21, 4  ;;  %s256_s23 = int_to_ptr.vmem [resolvable:$true] %s255_s23 }
  0x12   : > { %s257_s26 = sshll.u32 (!%p159_p10), %s253_s19, 4  ;;  %s242_s27 = scalar_lea.sflag (!%p159_p10), [#allocation3], %s181_s8  ;;  %s258_s26 = int_to_ptr.hbm [resolvable:$true] %s257_s26 }
  0x13   : > { %s413_s28 = sshra.s32 (!%p159_p10), %s258_s26, 4  ;;  %s414_s28 = int_to_ptr.hbm [resolvable:$true] %s413_s28 }
  0x14   : > { %v226_v0 = vld [vmem:[%s607_s1] sm:$0xf]  ;;  %v479_v1 = vmov 0   ;;  %s185_s30 = scalar_select %p184_p11, %s469_s15, 1  ;;  %vm192_vm0 = vcmask 125952  }
  0x15   : > { %396 = vset.pattern.permute.xlu0 %v479_v1  ;;  %v233_v2 = vld [vmem:[%s608_s2] sm:$0xf]  ;;  %s415_s15 = scalar_lea.hbm %s414_s28, 4  ;;  %p420_p1 = scmp.lt.s32.totalorder %s414_s28, %s609_s3 }
  0x16   : > { %229 = vperm.xlu0 %396, %v226_v0   ;;  %s335_s4 = sshll.u32 %s185_s30, 2  ;;  %p416_p12 = scmp.ne.s32.totalorder %s414_s28, %s415_s15 }
  0x17   : > { %s190_s7 = scalar_lea.vmem %s606_s0, %s335_s4  ;;  %s419_s4 = scalar_lea.hbm %s609_s3, 8 }
  0x18   : > { %v191_v3 = vld [vmem:[%s190_s7] sm:$0xf]  ;;  %p417_p13 = pnand %p416_p12, %p540_p4  ;;  %p421_p2 = scmp.lt.s32.totalorder %s419_s4, %s415_s15 }
  0x19   : > { %v193_v4 = vsel %vm192_vm0, %v191_v3, 0.0  ;;  %v200_v5 = vmul.f32 %v191_v3, %v191_v3 }
  0x1a   : > { %v194_v6 = vrot.slane %v193_v4, 4  ;;  %p418_p0 = pneg %p417_p13  ;;  %p422_p3 = por %p421_p2, %p420_p1 }
  0x1b   : > { %v201_v7 = vsel %vm192_vm0, %v200_v5, 0.0 }
  0x1c   : > { %v195_v8 = vadd.f32 %v194_v6, %v193_v4  ;;  %v202_v9 = vrot.slane %v201_v7, 4  ;;  %p423_p5 = pnand %p422_p3, %p418_p0 }
  0x1e   : > { %236 = vperm.xlu0 %396, %v233_v2   ;;  %v196_v10 = vrot.slane %v195_v8, 2  ;;  %v203_v11 = vadd.f32 %v202_v9, %v201_v7 }
  0x20   : > { %v197_v12 = vadd.f32 %v196_v10, %v195_v8  ;;  %v204_v13 = vrot.slane %v203_v11, 2 }
  0x22   : > { %v198_v14 = vrot.slane %v197_v12, 1  ;;  %v205_v15 = vadd.f32 %v204_v13, %v203_v11 }
  0x24   : > { %v199_v16 = vadd.f32 %v198_v14, %v197_v12  ;;  %v206_v17 = vrot.slane %v205_v15, 1 }
  0x26   : > { %v207_v18 = vadd.f32 %v206_v17, %v205_v15  ;;  %v208_v19 = vmul.f32 0.25, %v199_v16 }
  0x28   : > { %v209_v20 = vmul.f32 0.25, %v207_v18  ;;  %v210_v21 = vmul.f32 %v208_v19, %v208_v19  ;;  %v224_v31 = vsub.f32 %v191_v3, %v208_v19 }
  0x2a   : > { %v211_v22 = vsub.f32 %v209_v20, %v210_v21 }
  0x2c   : > { %v212_v23 = vmax.f32 %v211_v22, 0.0 }
  0x2e   : > { %v213_v24 = vadd.f32 1e-05, %v212_v23 }
  0x30   : > { %397 = vrsqrt.f32 %v213_v24  ;;  %vm220_vm1 = vweird.f32 %v213_v24 }
  0x36   : > { %v398_v25 = vpop.eup %397 }
  0x37   : > { %v215_v26 = vmul.f32 %v398_v25, %v213_v24  ;;  %vm221_vm2 = vweird.f32 %v398_v25 }
  0x38   : > { %vm222_vm3 = vmor %vm220_vm1, %vm221_vm2 }
  0x39   : > { %v216_v27 = vmul.f32 %v398_v25, %v215_v26 }
  0x3b   : > { %v217_v28 = vmul.f32 0.5, %v216_v27 }
  0x3d   : > { %v218_v29 = vsub.f32 1.5, %v217_v28 }
  0x3f   : > { %v219_v30 = vmul.f32 %v398_v25, %v218_v29 }
  0x41   : > { %v223_v33 = vsel %vm222_vm3, %v398_v25, %v219_v30 }
  0x42   : > { %v225_v34 = vmul.f32 %v224_v31, %v223_v33 }
  0x88   : > { %v230_v32 = vpop.permute.xlu0 %229 }
  0x89   : > { %v232_v35 = vmul.f32 %v230_v32, %v225_v34 }
  0x90   : > { %v237_v36 = vpop.permute.xlu0 %236 }
  0x91   : > { %v239_v37 = vadd.f32 %v237_v36, %v232_v35 }
  0x93   : > { %240 = vst.msk [vmem:[%s183_s21] sm:$0xf] %vm192_vm0, %v239_v37 }
  0x94   : > { %426 = shalt.err (!%p423_p5)
}
  0x95   : > { %340 = dma.vmem_to_hbm [thread:$0]  (%p540_p4), %s256_s23, 64, %s258_s26, %s242_s27  }
  0x96 PF: > { %p346_p6 = scmp.ge.s32.totalorder %s477_s17, 2  ;;  %s269_s7 = sand.u32 1, %s457_s12  }
  0x97   : > { %s270_s8 = scalar_lea.sflag [#allocation3], %s269_s7 }
  0x98   : > { %p343_p7 = pnand %p346_p6, %p547_p8 }
  0x9a   : > { %p344_p9 = pneg %p343_p7 }
  0x9c   : > { %452 = dma.done.wait (%p344_p9), %s270_s8, 64  }
  0x9d   : > { %454 = vsyncadd (%p344_p9), %s270_s8, 4294967232  ;;  %s16_s17 = sadd.s32 1, %s477_s17   ;;  %s612_s12 = smov %s461_s13 }
  0x9e   : > { %p13_p10 = scmp.ge.s32.totalorder %s16_s17, 4   ;;  %s613_s13 = smov %s465_s14 }
  0x9f   : > { %s614_s14 = smov %s553_s25  ;;  %s615_s15 = smov %s473_s16 }
  0xa0   : > { %s616_s16 = smov %s618_s20  ;;  %15 = sbr.rel (!%p13_p10) target bundleno = 4 (0x4), region = 67 }
  0xa5   :  { %276 = vsyncpa [#allocation3], 1 }
  0xa6   :  { %278 = vsyncpa [#allocation3 + $0x1], 1 }

</bundles_post_ra>
